<compile_context>
chip_gen: v5e
topology: v5e:2x2
jax: 0.10.0
libtpu: 0.0.40
codegen_flags: <defaults>
</compile_context>

<pallas_src>
import functools

import jax
import jax.numpy as jnp
from jax.experimental import pallas as pl
from jax.experimental.pallas import tpu as pltpu


# ----------------------------------------------------------------------------
# Kernel: one block of flattened (batch*ddim) rows per grid step.
# ----------------------------------------------------------------------------
def _mapping_kernel(lat_ref, gx_ref,
                    w2_ref, wmid_ref, wlast_ref, wc1_ref,
                    bhid_ref, bout_ref,
                    out_ref, *, num_layers, slope, compute_dtype):
    f32 = jnp.float32

    def leaky(v):
        # LeakyReLU(slope) == max(v, slope * v) for 0 < slope < 1 (f32 math).
        return jnp.maximum(v, slope * v)

    # conv2 + bn2 (folded) + leaky:   (rows, latdim) @ (latdim, hidden)
    h = leaky(jnp.dot(lat_ref[...], w2_ref[...], preferred_element_type=f32)
              + bhid_ref[0])

    # conv_list[i] + bn_list[i] (folded) + leaky, static small loop.
    for i in range(num_layers):
        h = leaky(jnp.dot(h.astype(compute_dtype), wmid_ref[i],
                          preferred_element_type=f32)
                  + bhid_ref[1 + i])

    # last_conv + bn3 (folded) + leaky:  (rows, hidden) @ (hidden, n_pts)
    h = leaky(jnp.dot(h.astype(compute_dtype), wlast_ref[...],
                      preferred_element_type=f32)
              + bout_ref[0])

    # Residual with the (hoisted) conv0 branch, then conv1 + bn1 (folded).
    z = h + gx_ref[...]                                  # f32 residual add
    out_ref[...] = (jnp.dot(z.astype(compute_dtype), wc1_ref[...],
                            preferred_element_type=f32)
                    + bout_ref[1])


def _const_spec(shape):
    nd = len(shape)
    return pl.BlockSpec(shape, lambda i, _nd=nd: (0,) * _nd)


def _fold_bn(w, b, gamma, beta, mean, var, eps):
    """Fold an eval-mode BatchNorm1d into the preceding 1x1 conv (exact affine)."""
    scale = gamma / jnp.sqrt(var + eps)
    return w * scale[..., :, None], (b - mean) * scale + beta


# ----------------------------------------------------------------------------
# Wrapper: BN folding, conv0 hoist, batch flattening / blocking, pallas_call.
# ----------------------------------------------------------------------------
def mapping2dto3d(x, latent, params, *, slope=0.1, eps=1e-5,
                  mxu_dtype=jnp.bfloat16, rows_per_step=256):
    """x: (B, dim_template, n_pts), latent: (B, latdim, ddim)  (NCW layouts).

    Returns (B, n_pts, ddim) float32 — same as the PyTorch forward (eval BN)."""
    assert rows_per_step % 8 == 0
    B, dim_t, n_pts = x.shape
    _, latdim, ddim = latent.shape
    num_layers = params["w_mid"].shape[0]

    # --- fold eval-mode BN into the convs ------------------------------------
    w2f, b2f = _fold_bn(params["w2"], params["b2"],
                        params["bn2_gamma"], params["bn2_beta"],
                        params["bn2_mean"], params["bn2_var"], eps)
    wmidf, bmidf = _fold_bn(params["w_mid"], params["b_mid"],
                            params["bnm_gamma"], params["bnm_beta"],
                            params["bnm_mean"], params["bnm_var"], eps)
    wlastf, blastf = _fold_bn(params["w_last"], params["b_last"],
                              params["bn3_gamma"], params["bn3_beta"],
                              params["bn3_mean"], params["bn3_var"], eps)
    wc1f, bc1f = _fold_bn(params["w1"], params["b1"],
                          params["bn1_gamma"], params["bn1_beta"],
                          params["bn1_mean"], params["bn1_var"], eps)

    # --- conv0 hoisted to the wrapper (one batched XLA matmul, K = dim_t) ----
    # gx[b, d, p] == conv0(x)[b, d, p]; flattened it is exactly the residual
    # the kernel needs in its (rows = b*ddim+d, lanes = n_pts) orientation.
    gx = jnp.einsum('oc,bcp->bop', params["w0"], x) + params["b0"][None, :, None]
    gx_flat = gx.reshape(B * ddim, n_pts).astype(jnp.float32)

    # --- latent flattened into the matmul M dimension (channels-last) --------
    lat_flat = jnp.transpose(latent, (0, 2, 1)).reshape(B * ddim, latdim)
    lat_flat = lat_flat.astype(mxu_dtype)

    # --- row blocking: few steps, each with MXU-filling M --------------------
    M = B * ddim
    if M <= rows_per_step:
        rows, steps = M, 1                         # block == full array dims
    else:
        rows = rows_per_step                       # multiple of 8
        steps = -(-M // rows)
    Mp = rows * steps
    if Mp > M:                                     # zero-pad; padded rows are
        lat_flat = jnp.pad(lat_flat, ((0, Mp - M), (0, 0)))   # sliced off below
        gx_flat = jnp.pad(gx_flat, ((0, Mp - M), (0, 0)))

    # --- constant operands (weights pre-transposed for y = x @ W^T + b) ------
    weights = [
        jnp.transpose(w2f).astype(mxu_dtype),               # (latdim, hidden)
        jnp.transpose(wmidf, (0, 2, 1)).astype(mxu_dtype),   # (L, hidden, hidden)
        jnp.transpose(wlastf).astype(mxu_dtype),             # (hidden, n_pts)
        jnp.transpose(wc1f).astype(mxu_dtype),               # (n_pts, n_pts)
        jnp.concatenate([b2f[None, :], bmidf], axis=0)[:, None, :]
            .astype(jnp.float32),                            # (L+1, 1, hidden)
        jnp.stack([blastf, bc1f])[:, None, :].astype(jnp.float32),  # (2, 1, n_pts)
    ]

    in_specs = [pl.BlockSpec((rows, latdim), lambda i: (i, 0)),
                pl.BlockSpec((rows, n_pts), lambda i: (i, 0))]
    in_specs += [_const_spec(w.shape) for w in weights]

    out_flat = pl.pallas_call(
        functools.partial(_mapping_kernel, num_layers=num_layers, slope=slope,
                          compute_dtype=mxu_dtype),
        out_shape=jax.ShapeDtypeStruct((Mp, n_pts), jnp.float32),
        grid=(steps,),
        in_specs=in_specs,
        out_specs=pl.BlockSpec((rows, n_pts), lambda i: (i, 0)),
        compiler_params=pltpu.CompilerParams(dimension_semantics=("parallel",)),
    )(lat_flat, gx_flat, *weights)

    # Back to the reference (B, n_pts, ddim) layout (wrapper-side plumbing).
    out = out_flat[:M].reshape(B, ddim, n_pts)
    return jnp.transpose(out, (0, 2, 1))


# ----------------------------------------------------------------------------
# Pure-JAX f32 reference of the PyTorch forward (eval-mode BN) for checking.
# ----------------------------------------------------------------------------
def mapping_reference(x, latent, params, *, slope=0.1, eps=1e-5):
    def conv(u, w, b):                       # 1x1 Conv1d on NCW layout
        return jnp.einsum('oc,bcl->bol', w, u) + b[None, :, None]

    def bn(y, g, be, m, v):                  # eval BatchNorm1d over channel axis 1
        return (y - m[:, None]) / jnp.sqrt(v[:, None] + eps) * g[:, None] + be[:, None]

    def leaky(v):
        return jnp.where(v >= 0, v, slope * v)

    gx = conv(x, params["w0"], params["b0"]).transpose(0, 2, 1)      # (B, n_pts, ddim)
    h = leaky(bn(conv(latent, params["w2"], params["b2"]),
                 params["bn2_gamma"], params["bn2_beta"],
                 params["bn2_mean"], params["bn2_var"]))
    for i in range(params["w_mid"].shape[0]):
        h = leaky(bn(conv(h, params["w_mid"][i], params["b_mid"][i]),
                     params["bnm_gamma"][i], params["bnm_beta"][i],
                     params["bnm_mean"][i], params["bnm_var"][i]))
    h = leaky(bn(conv(h, params["w_last"], params["b_last"]),
                 params["bn3_gamma"], params["bn3_beta"],
                 params["bn3_mean"], params["bn3_var"]))
    h = h + gx
    h = bn(conv(h, params["w1"], params["b1"]),
           params["bn1_gamma"], params["bn1_beta"],
           params["bn1_mean"], params["bn1_var"])
    return h                                                          # (B, n_pts, ddim)


# ----------------------------------------------------------------------------
# Deterministic synthetic parameter init (shapes from Mapping2Dto3D.__init__)
# ----------------------------------------------------------------------------
def init_params(key, *, dim_template, latdim, ddim, n_pts, hidden, num_layers):
    cnt = [0]

    def nk():
        cnt[0] += 1
        return jax.random.fold_in(key, cnt[0])

    def w(out_c, in_c):
        return (jax.random.normal(nk(), (out_c, in_c), jnp.float32)
                / jnp.sqrt(jnp.float32(in_c)))

    def b(out_c):
        return 0.01 * jax.random.normal(nk(), (out_c,), jnp.float32)

    def bn(c):
        return (1.0 + 0.1 * jax.random.normal(nk(), (c,), jnp.float32),   # gamma
                0.01 * jax.random.normal(nk(), (c,), jnp.float32),        # beta
                0.1 * jax.random.normal(nk(), (c,), jnp.float32),         # running mean
                jax.random.uniform(nk(), (c,), jnp.float32, 0.5, 1.5))    # running var

    params = dict(
        w0=w(ddim, dim_template), b0=b(ddim),                    # conv0
        w2=w(hidden, latdim), b2=b(hidden),                      # conv2
        w_mid=jnp.stack([w(hidden, hidden) for _ in range(num_layers)]),
        b_mid=jnp.stack([b(hidden) for _ in range(num_layers)]),
        w_last=w(n_pts, hidden), b_last=b(n_pts),                # last_conv
        w1=w(n_pts, n_pts), b1=b(n_pts),                         # conv1
    )
    params["bn2_gamma"], params["bn2_beta"], params["bn2_mean"], params["bn2_var"] = bn(hidden)
    bnm = [bn(hidden) for _ in range(num_layers)]
    params["bnm_gamma"] = jnp.stack([t[0] for t in bnm])
    params["bnm_beta"] = jnp.stack([t[1] for t in bnm])
    params["bnm_mean"] = jnp.stack([t[2] for t in bnm])
    params["bnm_var"] = jnp.stack([t[3] for t in bnm])
    params["bn3_gamma"], params["bn3_beta"], params["bn3_mean"], params["bn3_var"] = bn(n_pts)
    params["bn1_gamma"], params["bn1_beta"], params["bn1_mean"], params["bn1_var"] = bn(n_pts)
    return params


if __name__ == "__main__":
    key = jax.random.PRNGKey(0)
    kp, kx, kl = jax.random.split(key, 3)

    B = 2
    dim_template = 3        # template/grid coordinate dim (conv0 input channels)
    latdim, ddim = 64, 7
    n_pts, hidden, num_layers = 128, 64, 3

    params = init_params(kp, dim_template=dim_template, latdim=latdim, ddim=ddim,
                         n_pts=n_pts, hidden=hidden, num_layers=num_layers)

    x = jax.random.normal(kx, (B, dim_template, n_pts), jnp.float32)   # grid points (NCW)
    latent = jax.random.normal(kl, (B, latdim, ddim), jnp.float32)     # latent codes (NCW)

    out = mapping2dto3d(x, latent, params)
    out = jax.block_until_ready(out)

    assert out.shape == (B, n_pts, ddim), out.shape
    assert bool(jnp.all(jnp.isfinite(out)))

    # Correctness vs. pure-JAX f32 reference (loose tol: bf16 MXU inputs).
    ref = jax.block_until_ready(mapping_reference(x, latent, params))
    err = float(jnp.max(jnp.abs(out - ref)))
    scale = float(jnp.max(jnp.abs(ref))) + 1e-6
    assert err / scale < 0.08, (err, scale)

    print("KERNEL_OK")
</pallas_src>

<mosaic_0001>
module attributes {stable_mosaic.version = 11 : i64} {
  func.func @_mapping_kernel(%arg0: i32, %arg1: memref<14x64xbf16, #tpu.memory_space<vmem>>, %arg2: memref<14x128xf32, #tpu.memory_space<vmem>>, %arg3: memref<64x64xbf16, #tpu.memory_space<vmem>>, %arg4: memref<3x64x64xbf16, #tpu.memory_space<vmem>>, %arg5: memref<64x128xbf16, #tpu.memory_space<vmem>>, %arg6: memref<128x128xbf16, #tpu.memory_space<vmem>>, %arg7: memref<4x1x64xf32, #tpu.memory_space<vmem>>, %arg8: memref<2x1x128xf32, #tpu.memory_space<vmem>>, %arg9: memref<14x128xf32, #tpu.memory_space<vmem>>) attributes {dimension_semantics = [#tpu.dimension_semantics<parallel>], iteration_bounds = array<i64: 1>, scalar_prefetch = 0 : i64, scratch_operands = 0 : i64, tpu.core_type = #tpu.core_type<tc>, window_params = [{transform_indices = @transform_0, window_bounds = array<i64: 14, 64>}, {transform_indices = @transform_1, window_bounds = array<i64: 14, 128>}, {pipeline_mode = #tpu.pipeline_mode<synchronous>, transform_indices = @transform_2, window_bounds = array<i64: 64, 64>}, {pipeline_mode = #tpu.pipeline_mode<synchronous>, transform_indices = @transform_3, window_bounds = array<i64: 3, 64, 64>}, {pipeline_mode = #tpu.pipeline_mode<synchronous>, transform_indices = @transform_4, window_bounds = array<i64: 64, 128>}, {pipeline_mode = #tpu.pipeline_mode<synchronous>, transform_indices = @transform_5, window_bounds = array<i64: 128, 128>}, {pipeline_mode = #tpu.pipeline_mode<synchronous>, transform_indices = @transform_6, window_bounds = array<i64: 4, 1, 64>}, {pipeline_mode = #tpu.pipeline_mode<synchronous>, transform_indices = @transform_7, window_bounds = array<i64: 2, 1, 128>}, {transform_indices = @transform_8, window_bounds = array<i64: 14, 128>}]} {
    %c0 = arith.constant 0 : index
    %c0_0 = arith.constant 0 : index
    %0 = vector.load %arg1[%c0, %c0_0] : memref<14x64xbf16, #tpu.memory_space<vmem>>, vector<14x64xbf16>
    %c0_1 = arith.constant 0 : index
    %c0_2 = arith.constant 0 : index
    %1 = vector.load %arg3[%c0_1, %c0_2] : memref<64x64xbf16, #tpu.memory_space<vmem>>, vector<64x64xbf16>
    %cst = arith.constant dense<0.000000e+00> : vector<14x64xf32>
    %2 = tpu.matmul %0, %1, %cst {dimension_numbers = #tpu.dot_dimension_numbers<[1], [0], [0], [1], [0, 0, 1, 1], [], []>} : vector<14x64xbf16>, vector<64x64xbf16>, vector<14x64xf32> -> vector<14x64xf32>
    %c0_3 = arith.constant 0 : index
    %c0_4 = arith.constant 0 : index
    %c0_5 = arith.constant 0 : index
    %3 = vector.load %arg7[%c0_3, %c0_4, %c0_5] : memref<4x1x64xf32, #tpu.memory_space<vmem>>, vector<1x1x64xf32>
    %4 = vector.shape_cast %3 : vector<1x1x64xf32> to vector<1x64xf32>
    %5 = vector.broadcast %4 : vector<1x64xf32> to vector<14x64xf32>
    %6 = arith.addf %2, %5 : vector<14x64xf32>
    %cst_6 = arith.constant 1.000000e-01 : f32
    %7 = vector.broadcast %cst_6 : f32 to vector<14x64xf32>
    %8 = arith.mulf %7, %6 : vector<14x64xf32>
    %9 = arith.maximumf %6, %8 : vector<14x64xf32>
    %10 = arith.truncf %9 : vector<14x64xf32> to vector<14x64xbf16>
    %c0_7 = arith.constant 0 : index
    %c0_8 = arith.constant 0 : index
    %c0_9 = arith.constant 0 : index
    %11 = vector.load %arg4[%c0_7, %c0_8, %c0_9] : memref<3x64x64xbf16, #tpu.memory_space<vmem>>, vector<1x64x64xbf16>
    %12 = vector.shape_cast %11 : vector<1x64x64xbf16> to vector<64x64xbf16>
    %cst_10 = arith.constant dense<0.000000e+00> : vector<14x64xf32>
    %13 = tpu.matmul %10, %12, %cst_10 {dimension_numbers = #tpu.dot_dimension_numbers<[1], [0], [0], [1], [0, 0, 1, 1], [], []>} : vector<14x64xbf16>, vector<64x64xbf16>, vector<14x64xf32> -> vector<14x64xf32>
    %c1 = arith.constant 1 : index
    %c0_11 = arith.constant 0 : index
    %c0_12 = arith.constant 0 : index
    %14 = vector.load %arg7[%c1, %c0_11, %c0_12] : memref<4x1x64xf32, #tpu.memory_space<vmem>>, vector<1x1x64xf32>
    %15 = vector.shape_cast %14 : vector<1x1x64xf32> to vector<1x64xf32>
    %16 = vector.broadcast %15 : vector<1x64xf32> to vector<14x64xf32>
    %17 = arith.addf %13, %16 : vector<14x64xf32>
    %cst_13 = arith.constant 1.000000e-01 : f32
    %18 = vector.broadcast %cst_13 : f32 to vector<14x64xf32>
    %19 = arith.mulf %18, %17 : vector<14x64xf32>
    %20 = arith.maximumf %17, %19 : vector<14x64xf32>
    %21 = arith.truncf %20 : vector<14x64xf32> to vector<14x64xbf16>
    %c1_14 = arith.constant 1 : index
    %c0_15 = arith.constant 0 : index
    %c0_16 = arith.constant 0 : index
    %22 = vector.load %arg4[%c1_14, %c0_15, %c0_16] : memref<3x64x64xbf16, #tpu.memory_space<vmem>>, vector<1x64x64xbf16>
    %23 = vector.shape_cast %22 : vector<1x64x64xbf16> to vector<64x64xbf16>
    %cst_17 = arith.constant dense<0.000000e+00> : vector<14x64xf32>
    %24 = tpu.matmul %21, %23, %cst_17 {dimension_numbers = #tpu.dot_dimension_numbers<[1], [0], [0], [1], [0, 0, 1, 1], [], []>} : vector<14x64xbf16>, vector<64x64xbf16>, vector<14x64xf32> -> vector<14x64xf32>
    %c2 = arith.constant 2 : index
    %c0_18 = arith.constant 0 : index
    %c0_19 = arith.constant 0 : index
    %25 = vector.load %arg7[%c2, %c0_18, %c0_19] : memref<4x1x64xf32, #tpu.memory_space<vmem>>, vector<1x1x64xf32>
    %26 = vector.shape_cast %25 : vector<1x1x64xf32> to vector<1x64xf32>
    %27 = vector.broadcast %26 : vector<1x64xf32> to vector<14x64xf32>
    %28 = arith.addf %24, %27 : vector<14x64xf32>
    %cst_20 = arith.constant 1.000000e-01 : f32
    %29 = vector.broadcast %cst_20 : f32 to vector<14x64xf32>
    %30 = arith.mulf %29, %28 : vector<14x64xf32>
    %31 = arith.maximumf %28, %30 : vector<14x64xf32>
    %32 = arith.truncf %31 : vector<14x64xf32> to vector<14x64xbf16>
    %c2_21 = arith.constant 2 : index
    %c0_22 = arith.constant 0 : index
    %c0_23 = arith.constant 0 : index
    %33 = vector.load %arg4[%c2_21, %c0_22, %c0_23] : memref<3x64x64xbf16, #tpu.memory_space<vmem>>, vector<1x64x64xbf16>
    %34 = vector.shape_cast %33 : vector<1x64x64xbf16> to vector<64x64xbf16>
    %cst_24 = arith.constant dense<0.000000e+00> : vector<14x64xf32>
    %35 = tpu.matmul %32, %34, %cst_24 {dimension_numbers = #tpu.dot_dimension_numbers<[1], [0], [0], [1], [0, 0, 1, 1], [], []>} : vector<14x64xbf16>, vector<64x64xbf16>, vector<14x64xf32> -> vector<14x64xf32>
    %c3 = arith.constant 3 : index
    %c0_25 = arith.constant 0 : index
    %c0_26 = arith.constant 0 : index
    %36 = vector.load %arg7[%c3, %c0_25, %c0_26] : memref<4x1x64xf32, #tpu.memory_space<vmem>>, vector<1x1x64xf32>
    %37 = vector.shape_cast %36 : vector<1x1x64xf32> to vector<1x64xf32>
    %38 = vector.broadcast %37 : vector<1x64xf32> to vector<14x64xf32>
    %39 = arith.addf %35, %38 : vector<14x64xf32>
    %cst_27 = arith.constant 1.000000e-01 : f32
    %40 = vector.broadcast %cst_27 : f32 to vector<14x64xf32>
    %41 = arith.mulf %40, %39 : vector<14x64xf32>
    %42 = arith.maximumf %39, %41 : vector<14x64xf32>
    %43 = arith.truncf %42 : vector<14x64xf32> to vector<14x64xbf16>
    %c0_28 = arith.constant 0 : index
    %c0_29 = arith.constant 0 : index
    %44 = vector.load %arg5[%c0_28, %c0_29] : memref<64x128xbf16, #tpu.memory_space<vmem>>, vector<64x128xbf16>
    %cst_30 = arith.constant dense<0.000000e+00> : vector<14x128xf32>
    %45 = tpu.matmul %43, %44, %cst_30 {dimension_numbers = #tpu.dot_dimension_numbers<[1], [0], [0], [1], [0, 0, 1, 1], [], []>} : vector<14x64xbf16>, vector<64x128xbf16>, vector<14x128xf32> -> vector<14x128xf32>
    %c0_31 = arith.constant 0 : index
    %c0_32 = arith.constant 0 : index
    %c0_33 = arith.constant 0 : index
    %46 = vector.load %arg8[%c0_31, %c0_32, %c0_33] : memref<2x1x128xf32, #tpu.memory_space<vmem>>, vector<1x1x128xf32>
    %47 = vector.shape_cast %46 : vector<1x1x128xf32> to vector<1x128xf32>
    %48 = vector.broadcast %47 : vector<1x128xf32> to vector<14x128xf32>
    %49 = arith.addf %45, %48 : vector<14x128xf32>
    %cst_34 = arith.constant 1.000000e-01 : f32
    %50 = vector.broadcast %cst_34 : f32 to vector<14x128xf32>
    %51 = arith.mulf %50, %49 : vector<14x128xf32>
    %52 = arith.maximumf %49, %51 : vector<14x128xf32>
    %c0_35 = arith.constant 0 : index
    %c0_36 = arith.constant 0 : index
    %53 = vector.load %arg2[%c0_35, %c0_36] : memref<14x128xf32, #tpu.memory_space<vmem>>, vector<14x128xf32>
    %54 = arith.addf %52, %53 : vector<14x128xf32>
    %55 = arith.truncf %54 : vector<14x128xf32> to vector<14x128xbf16>
    %c0_37 = arith.constant 0 : index
    %c0_38 = arith.constant 0 : index
    %56 = vector.load %arg6[%c0_37, %c0_38] : memref<128x128xbf16, #tpu.memory_space<vmem>>, vector<128x128xbf16>
    %cst_39 = arith.constant dense<0.000000e+00> : vector<14x128xf32>
    %57 = tpu.matmul %55, %56, %cst_39 {dimension_numbers = #tpu.dot_dimension_numbers<[1], [0], [0], [1], [0, 0, 1, 1], [], []>} : vector<14x128xbf16>, vector<128x128xbf16>, vector<14x128xf32> -> vector<14x128xf32>
    %c1_40 = arith.constant 1 : index
    %c0_41 = arith.constant 0 : index
    %c0_42 = arith.constant 0 : index
    %58 = vector.load %arg8[%c1_40, %c0_41, %c0_42] : memref<2x1x128xf32, #tpu.memory_space<vmem>>, vector<1x1x128xf32>
    %59 = vector.shape_cast %58 : vector<1x1x128xf32> to vector<1x128xf32>
    %60 = vector.broadcast %59 : vector<1x128xf32> to vector<14x128xf32>
    %61 = arith.addf %57, %60 : vector<14x128xf32>
    %c0_43 = arith.constant 0 : index
    %c0_44 = arith.constant 0 : index
    %62 = vector.load %arg9[%c0_43, %c0_44] : memref<14x128xf32, #tpu.memory_space<vmem>>, vector<14x128xf32>
    tpu.vector_store %arg9[%c0_43, %c0_44], %61 {strides = array<i32>} : memref<14x128xf32, #tpu.memory_space<vmem>>, vector<14x128xf32>,
    return
  }
  func.func @transform_0(%arg0: i32) -> (i32, i32) {
    %c0_i32 = arith.constant 0 : i32
    %c0_i32_0 = arith.constant 0 : i32
    return %arg0, %c0_i32 : i32, i32
  }
  func.func @transform_1(%arg0: i32) -> (i32, i32) {
    %c0_i32 = arith.constant 0 : i32
    %c0_i32_0 = arith.constant 0 : i32
    return %arg0, %c0_i32 : i32, i32
  }
  func.func @transform_2(%arg0: i32) -> (i32, i32) {
    %c0_i32 = arith.constant 0 : i32
    %c0_i32_0 = arith.constant 0 : i32
    %c0_i32_1 = arith.constant 0 : i32
    return %c0_i32, %c0_i32_0 : i32, i32
  }
  func.func @transform_3(%arg0: i32) -> (i32, i32, i32) {
    %c0_i32 = arith.constant 0 : i32
    %c0_i32_0 = arith.constant 0 : i32
    %c0_i32_1 = arith.constant 0 : i32
    %c0_i32_2 = arith.constant 0 : i32
    return %c0_i32, %c0_i32_0, %c0_i32_1 : i32, i32, i32
  }
  func.func @transform_4(%arg0: i32) -> (i32, i32) {
    %c0_i32 = arith.constant 0 : i32
    %c0_i32_0 = arith.constant 0 : i32
    %c0_i32_1 = arith.constant 0 : i32
    return %c0_i32, %c0_i32_0 : i32, i32
  }
  func.func @transform_5(%arg0: i32) -> (i32, i32) {
    %c0_i32 = arith.constant 0 : i32
    %c0_i32_0 = arith.constant 0 : i32
    %c0_i32_1 = arith.constant 0 : i32
    return %c0_i32, %c0_i32_0 : i32, i32
  }
  func.func @transform_6(%arg0: i32) -> (i32, i32, i32) {
    %c0_i32 = arith.constant 0 : i32
    %c0_i32_0 = arith.constant 0 : i32
    %c0_i32_1 = arith.constant 0 : i32
    %c0_i32_2 = arith.constant 0 : i32
    return %c0_i32, %c0_i32_0, %c0_i32_1 : i32, i32, i32
  }
  func.func @transform_7(%arg0: i32) -> (i32, i32, i32) {
    %c0_i32 = arith.constant 0 : i32
    %c0_i32_0 = arith.constant 0 : i32
    %c0_i32_1 = arith.constant 0 : i32
    %c0_i32_2 = arith.constant 0 : i32
    return %c0_i32, %c0_i32_0, %c0_i32_1 : i32, i32, i32
  }
  func.func @transform_8(%arg0: i32) -> (i32, i32) {
    %c0_i32 = arith.constant 0 : i32
    %c0_i32_0 = arith.constant 0 : i32
    return %arg0, %c0_i32 : i32, i32
  }
}

</mosaic_0001>

<bundles_post_ra>
// kernel: tpu_custom_call.1
= control target key start
LH: loop header
LB: loop body
LE: loop exit
PB: predicated region body
PF: predicated region fallthrough
CT: control target
= control target key end

     0   :  { %13 = vsyncpa [#allocation3], 0  ;;  %s994_s0 = inlined_call_operand.hbm [shape: bf16[14,64], index: 0, kind: input, shape index: {}]   ;;  %s995_s1 = inlined_call_operand.hbm [shape: f32[14,128], index: 1, kind: input, shape index: {}]   ;;  %s996_s2 = inlined_call_operand.hbm [shape: bf16[64,64], index: 2, kind: input, shape index: {}]   ;;  %s997_s3 = inlined_call_operand.hbm [shape: bf16[3,64,64], index: 3, kind: input, shape index: {}]   ;;  %s998_s4 = inlined_call_operand.hbm [shape: bf16[64,128], index: 4, kind: input, shape index: {}]   ;;  %s999_s5 = inlined_call_operand.hbm [shape: bf16[128,128], index: 5, kind: input, shape index: {}]   ;;  %s1000_s6 = inlined_call_operand.vmem [shape: f32[4,1,64], index: 6, kind: input, shape index: {}]   ;;  %s1001_s7 = inlined_call_operand.vmem [shape: f32[2,1,128], index: 7, kind: input, shape index: {}]   ;;  %s1002_s8 = inlined_call_operand.hbm [shape: f32[14,128], index: 8, kind: output, shape index: {}]  }
   0x1   :  { %14 = vsyncpa [#allocation6], 0 }
   0x2   :  { %15 = vsyncpa [#allocation9], 0 }
   0x3   :  { %16 = vsyncpa [#allocation12], 0  ;;  %s35_s29 = sshll.u32 %s995_s1, 4  ;;  %s36_s29 = int_to_ptr.hbm [resolvable:$true] %s35_s29 }
   0x4   :  { %17 = vsyncpa [#allocation4], 0  ;;  %s888_s30 = smov [#allocation5]   ;;  %s889_s10 = smov 128  }
   0x5   :  { %s37_s9 = sshll.u32 %s888_s30, 4  ;;  %s890_s11 = smov 8   ;;  %s38_s9 = int_to_ptr.vmem [resolvable:$true] %s37_s9 }
   0x6   :  { %43 = dma.hbm_to_vmem [thread:$0]  %s36_s29, 256, %s38_s9, [#allocation6], %s889_s10, %s889_s10, %s890_s11  }
   0x7   :  { %s61_s14 = sshll.u32 %s997_s3, 4  ;;  %s891_s15 = smov [#allocation8]   ;;  %s62_s14 = int_to_ptr.hbm [resolvable:$true] %s61_s14 }
   0x8   :  { %s63_s16 = sshll.u32 %s891_s15, 4  ;;  %s22_s18 = sshll.u32 %s994_s0, 4  ;;  %s64_s16 = int_to_ptr.vmem [resolvable:$true] %s63_s16  ;;  %s23_s18 = int_to_ptr.hbm [resolvable:$true] %s22_s18 }
   0x9   :  { %s892_s19 = smov 64   ;;  %s893_s20 = smov 4  }
   0xa   :  { %69 = dma.hbm_to_vmem [thread:$0]  %s62_s14, 1536, %s64_s16, [#allocation9], %s892_s19, %s892_s19, %s893_s20  }
   0xb   :  { %s48_s23 = sshll.u32 %s996_s2, 4  ;;  %s894_s24 = smov [#allocation2]   ;;  %s49_s23 = int_to_ptr.hbm [resolvable:$true] %s48_s23 }
   0xc   :  { %s24_s25 = sshll.u32 %s894_s24, 4  ;;  %s895_s3 = smov [#allocation7]   ;;  %s25_s25 = int_to_ptr.vmem [resolvable:$true] %s24_s25 }
   0xd   :  { %30 = dma.hbm_to_vmem [thread:$0]  %s23_s18, 128, %s25_s25, [#allocation3], %s892_s19, %s892_s19, %s893_s20  }
   0xe   :  { %s50_s26 = sshll.u32 %s895_s3, 4  ;;  %s74_s0 = sshll.u32 %s998_s4, 4  ;;  %s51_s26 = int_to_ptr.vmem [resolvable:$true] %s50_s26  ;;  %s75_s0 = int_to_ptr.hbm [resolvable:$true] %s74_s0 }
   0xf   :  { %56 = dma.hbm_to_vmem [thread:$0]  %s49_s23, 512, %s51_s26, [#allocation6], %s892_s19, %s892_s19, %s893_s20  }
  0x10   :  { %s87_s9 = sshll.u32 %s999_s5, 4  ;;  %s896_s12 = smov [#allocation10]   ;;  %s88_s9 = int_to_ptr.hbm [resolvable:$true] %s87_s9 }
  0x11   :  { %s76_s2 = sshll.u32 %s896_s12, 4  ;;  %s897_s13 = smov [#allocation11]   ;;  %s77_s2 = int_to_ptr.vmem [resolvable:$true] %s76_s2 }
  0x12   :  { %82 = dma.hbm_to_vmem [thread:$0]  %s75_s0, 512, %s77_s2, [#allocation9], %s892_s19, %s892_s19, %s893_s20  }
  0x13   :  { %s89_s14 = sshll.u32 %s897_s13, 4  ;;  %s90_s14 = int_to_ptr.vmem [resolvable:$true] %s89_s14 }
  0x14   :  { %95 = dma.hbm_to_vmem [thread:$0]  %s88_s9, 1024, %s90_s14, [#allocation12], %s892_s19, %s892_s19, %s893_s20  }
  0x15   :  { %878 = dma.done.wait [#allocation3], 128  }
  0x16   :  { %879 = vsyncadd [#allocation3], 4294967168 }
  0x17   :  { %880 = dma.done.wait [#allocation6], 768  }
  0x18   :  { %881 = vsyncadd [#allocation6], 4294966528 }
  0x19   :  { %882 = dma.done.wait [#allocation9], 2048  }
  0x1a   :  { %883 = vsyncadd [#allocation9], 4294965248 }
  0x1b   :  { %884 = dma.done.wait [#allocation12], 1024  }
  0x1c   :  { %885 = vsyncadd [#allocation12], 4294966272  ;;  %v668_v0 = vld [vmem:[#allocation7 + $0x18] sm:$0xff]  ;;  %v667_v1 = vld [vmem:[#allocation7 + $0x10] sm:$0xff]  ;;  %vm168_vm0 = vcmask 523264   ;;  %s898_s23 = smov [#allocation13]  }
  0x1d   :  { %176 = vmatpush.bf16.msra.mxu0 %v668_v0  ;;  %v666_v2 = vld [vmem:[#allocation7 + $0x8] sm:$0xff]  ;;  %v665_v3 = vld [vmem:[#allocation7] sm:$0xff]  ;;  %v672_v7 = vld [vmem:[#allocation8 + $0x18] sm:$0xff]  ;;  %s521_s24 = sshll.u32 %s898_s23, 4  ;;  %s523_s26 = sshll.u32 %s1002_s8, 4  ;;  %s522_s24 = int_to_ptr.vmem [resolvable:$true] %s521_s24  ;;  %s524_s26 = int_to_ptr.hbm [resolvable:$true] %s523_s26 }
  0x1e   :  { %v541_v4 = vld [vmem:[#allocation2] sm:$0xf]  ;;  %v664_v5 = vld [vmem:[#allocation2] sm:$0x70]  ;;  %235 = vmatpush.bf16.msra.mxu2 %v672_v7  ;;  %v671_v8 = vld [vmem:[#allocation8 + $0x10] sm:$0xff] }
  0x1f   :  { %v542_v6 = vor.u32 %v664_v5, %v541_v4  ;;  %v670_v9 = vld [vmem:[#allocation8 + $0x8] sm:$0xff]  ;;  %v669_v10 = vld [vmem:[#allocation8] sm:$0xff]  ;;  %v676_v21 = vld [vmem:[#allocation8 + $0x38] sm:$0xff] }
  0x20   :  { %v704_v12 = vld [vmem:[%s1000_s6] ss:$0 sm:$0xff]  ;;  %v675_v22 = vld [vmem:[#allocation8 + $0x30] sm:$0xff]  ;;  %v673_v24 = vld [vmem:[#allocation8 + $0x20] sm:$0xff] }
  0x21   :  { %177 = vmatpush.bf16.msra.mxu0 %v667_v1  ;;  %v674_v23 = vld [vmem:[#allocation8 + $0x28] sm:$0xff]  ;;  %v680_v35 = vld [vmem:[#allocation8 + $0x58] sm:$0xff]  ;;  %v679_v36 = vld [vmem:[#allocation8 + $0x50] sm:$0xff] }
  0x22   :  { %236 = vmatpush.bf16.msra.mxu2 %v671_v8  ;;  %v705_v26 = vld [vmem:[%s1000_s6 + $0x1] ss:$0 sm:$0xff]  ;;  %355 = vmatpush.bf16.msra.mxu3 %v680_v35  ;;  %v677_v38 = vld [vmem:[#allocation8 + $0x40] sm:$0xff]  ;;  %v706_v40 = vld [vmem:[%s1000_s6 + $0x2] ss:$0 sm:$0xff] }
  0x23   :  { %v678_v37 = vld [vmem:[#allocation8 + $0x48] sm:$0xff]  ;;  %v684_v49 = vld [vmem:[#allocation10 + $0x18] sm:$0xff]  ;;  %v683_v50 = vld [vmem:[#allocation10 + $0x10] sm:$0xff] }
  0x24   :  { %v682_v51 = vld [vmem:[#allocation10 + $0x8] sm:$0xff]  ;;  %v681_v52 = vld [vmem:[#allocation10] sm:$0xff]  ;;  %v692_v53 = vld [vmem:[#allocation11 + $0x38] sm:$0xff] }
  0x25   :  { %178 = vmatpush.bf16.msra.mxu0 %v666_v2  ;;  %501 = vmatpush.bf16.msra.mxu1 %v692_v53  ;;  %v691_v54 = vld [vmem:[#allocation11 + $0x30] sm:$0xff]  ;;  %v690_v55 = vld [vmem:[#allocation11 + $0x28] sm:$0xff]  ;;  %v689_v2 = vld [vmem:[#allocation11 + $0x20] sm:$0xff] }
  0x26   :  { %237 = vmatpush.bf16.msra.mxu2 %v670_v9  ;;  %356 = vmatpush.bf16.msra.mxu3 %v679_v36  ;;  %v707_v57 = vld [vmem:[%s1000_s6 + $0x3] ss:$0 sm:$0xff]  ;;  %v687_v4 = vld [vmem:[#allocation11 + $0x10] sm:$0xff]  ;;  %v708_v7 = vld [vmem:[%s1001_s7] ss:$0 sm:$0xff] }
  0x27   :  { %v686_v5 = vld [vmem:[#allocation11 + $0x8] sm:$0xff] }
  0x29   :  { %179 = vmatpush.bf16.msra.mxu0 %v665_v3  ;;  %502 = vmatpush.bf16.msra.mxu1 %v691_v54  ;;  %v688_v3 = vld [vmem:[#allocation11 + $0x18] sm:$0xff] }
  0x2a   :  { %238 = vmatpush.bf16.msra.mxu2 %v669_v10  ;;  %357 = vmatpush.bf16.msra.mxu3 %v678_v37 }
  0x2c   :  { %559 = vmatmul.msk.bf16.vlgmr.msra.gmra.mxu0 %vm168_vm0, %v542_v6  ;;  %v685_v6 = vld [vmem:[#allocation11] sm:$0xff] }
  0x2d   :  { %413 = vmatpush.bf16.msrb.mxu0 %v684_v49  ;;  %503 = vmatpush.bf16.msra.mxu1 %v690_v55 }
  0x2e   :  { %295 = vmatpush.bf16.msrb.mxu2 %v676_v21  ;;  %358 = vmatpush.bf16.msra.mxu3 %v677_v38  ;;  %v709_v21 = vld [vmem:[%s1001_s7 + $0x1] ss:$0 sm:$0xff] }
  0x31   :  { %414 = vmatpush.bf16.msrb.mxu0 %v683_v50  ;;  %504 = vmatpush.bf16.msra.mxu1 %v689_v2 }
  0x32   :  { %296 = vmatpush.bf16.msrb.mxu2 %v675_v22 }
  0x35   :  { %415 = vmatpush.bf16.msrb.mxu0 %v682_v51  ;;  %505 = vmatpush.bf16.msra.mxu1 %v688_v3 }
  0x36   :  { %297 = vmatpush.bf16.msrb.mxu2 %v674_v23 }
  0x39   :  { %416 = vmatpush.bf16.msrb.mxu0 %v681_v52  ;;  %506 = vmatpush.bf16.msra.mxu1 %v687_v4 }
  0x3a   :  { %298 = vmatpush.bf16.msrb.mxu2 %v673_v24 }
  0x3d   :  { %507 = vmatpush.bf16.msra.mxu1 %v686_v5 }
  0x41   :  { %508 = vmatpush.bf16.msra.mxu1 %v685_v6 }
  0xa9   :  { %v181_v11 = vpop.f32.mrf.mxu0 }
  0xaa   :  { %v182_v13 = vadd.f32 %v704_v12, %v181_v11 }
  0xac   :  { %v186_v15 = vmul.f32 0.1, %v182_v13 }
  0xae   :  { %v188_v18 = vmax.f32 %v182_v13, %v186_v15  ;;  %v427_v15 = vld [vmem:[#allocation5] sm:$0xff] }
  0xb1   :  { %v183_v14 = vpop.f32.mrf.mxu0 }
  0xb2   :  { %v184_v16 = vadd.f32 %v704_v12, %v183_v14 }
  0xb4   :  { %v187_v17 = vmul.f32 0.1, %v184_v16 }
  0xb6   :  { %v189_v19 = vmax.f32 %v184_v16, %v187_v17  ;;  %v428_v16 = vld [vmem:[#allocation5 + $0x8] sm:$0x3f] }
  0xb8   :  { %v190_v20 = vpack.c.bf16 %v189_v19, %v188_v18 }
  0xba   :  { %577 = vmatmul.msk.bf16.vlgmr.msra.gmra.mxu2 %vm168_vm0, %v190_v20 }
 0x13d   :  { %v240_v25 = vpop.f32.mrf.mxu2 }
 0x13e   :  { %v241_v27 = vadd.f32 %v705_v26, %v240_v25 }
 0x140   :  { %v245_v29 = vmul.f32 0.1, %v241_v27 }
 0x142   :  { %v247_v32 = vmax.f32 %v241_v27, %v245_v29 }
 0x145   :  { %v242_v28 = vpop.f32.mrf.mxu2 }
 0x146   :  { %v243_v30 = vadd.f32 %v705_v26, %v242_v28 }
 0x148   :  { %v246_v31 = vmul.f32 0.1, %v243_v30 }
 0x14a   :  { %v248_v33 = vmax.f32 %v243_v30, %v246_v31 }
 0x14c   :  { %v249_v34 = vpack.c.bf16 %v248_v33, %v247_v32 }
 0x14e   :  { %595 = vmatmul.msk.bf16.vlgmr.msrb.gmra.mxu2 %vm168_vm0, %v249_v34 }
 0x1d1   :  { %v300_v39 = vpop.f32.mrf.mxu2 }
 0x1d2   :  { %v301_v41 = vadd.f32 %v706_v40, %v300_v39 }
 0x1d4   :  { %v305_v43 = vmul.f32 0.1, %v301_v41 }
 0x1d6   :  { %v307_v46 = vmax.f32 %v301_v41, %v305_v43 }
 0x1d9   :  { %v302_v42 = vpop.f32.mrf.mxu2 }
 0x1da   :  { %v303_v44 = vadd.f32 %v706_v40, %v302_v42 }
 0x1dc   :  { %v306_v45 = vmul.f32 0.1, %v303_v44 }
 0x1de   :  { %v308_v47 = vmax.f32 %v303_v44, %v306_v45 }
 0x1e0   :  { %v309_v48 = vpack.c.bf16 %v308_v47, %v307_v46 }
 0x1e2   :  { %613 = vmatmul.msk.bf16.vlgmr.msra.gmra.mxu3 %vm168_vm0, %v309_v48 }
 0x265   :  { %v360_v56 = vpop.f32.mrf.mxu3 }
 0x266   :  { %v361_v58 = vadd.f32 %v707_v57, %v360_v56 }
 0x268   :  { %v365_v60 = vmul.f32 0.1, %v361_v58 }
 0x26a   :  { %v367_v63 = vmax.f32 %v361_v58, %v365_v60 }
 0x26d   :  { %v362_v59 = vpop.f32.mrf.mxu3 }
 0x26e   :  { %v363_v61 = vadd.f32 %v707_v57, %v362_v59 }
 0x270   :  { %v366_v62 = vmul.f32 0.1, %v363_v61 }
 0x272   :  { %v368_v0 = vmax.f32 %v363_v61, %v366_v62 }
 0x274   :  { %v369_v1 = vpack.c.bf16 %v368_v0, %v367_v63 }
 0x276   :  { %630 = vmatmul.msk.bf16.vlgmr.msrb.gmra.mxu0 %vm168_vm0, %v369_v1 }
 0x2f3   :  { %v418_v8 = vpop.f32.mrf.mxu0 }
 0x2f4   :  { %v419_v9 = vadd.f32 %v708_v7, %v418_v8 }
 0x2f6   :  { %v423_v10 = vmul.f32 0.1, %v419_v9 }
 0x2f8   :  { %v425_v13 = vmax.f32 %v419_v9, %v423_v10 }
 0x2fa   :  { %v429_v18 = vadd.f32 %v427_v15, %v425_v13 }
 0x2fb   :  { %v420_v11 = vpop.f32.mrf.mxu0 }
 0x2fc   :  { %v421_v12 = vadd.f32 %v708_v7, %v420_v11 }
 0x2fe   :  { %v424_v14 = vmul.f32 0.1, %v421_v12 }
 0x300   :  { %v426_v17 = vmax.f32 %v421_v12, %v424_v14 }
 0x302   :  { %v430_v19 = vadd.f32 %v428_v16, %v426_v17 }
 0x304   :  { %v431_v20 = vpack.c.bf16 %v430_v19, %v429_v18 }
 0x306   :  { %509 = vmatmul.bf16.vlgmr.msra.gmra.mxu1 %v431_v20 }
 0x383   :  { %v510_v22 = vpop.f32.mrf.mxu1 }
 0x384   :  { %v511_v23 = vadd.f32 %v709_v21, %v510_v22 }
 0x386   :  { %515 = vst [vmem:[#allocation13] sm:$0xff] %v511_v23 }
 0x38b   :  { %v512_v24 = vpop.f32.mrf.mxu1 }
 0x38c   :  { %v513_v25 = vadd.f32 %v709_v21, %v512_v24 }
 0x38e   :  { %516 = vst [vmem:[#allocation13 + $0x8] sm:$0x3f] %v513_v25 }
 0x38f   :  { %529 = dma.vmem_to_hbm [thread:$0]  %s522_s24, 256, %s524_s26, [#allocation4], %s889_s10, %s889_s10, %s890_s11  }
 0x390   :  { %886 = dma.done.wait [#allocation4], 256  }
 0x391   :  { %887 = vsyncadd [#allocation4], 4294967040 }
 0x392   :  { %534 = vsyncpa [#allocation3], 1 }
 0x393   :  { %535 = vsyncpa [#allocation6], 1 }
 0x394   :  { %536 = vsyncpa [#allocation9], 1 }
 0x395   :  { %537 = vsyncpa [#allocation12], 1 }
 0x396   :  { %538 = vsyncpa [#allocation4], 1 }

</bundles_post_ra>
